<compile_context>
chip_gen: v7x
topology: tpu7x:2x2x1
jax: 0.10.0
libtpu: 0.0.40
codegen_flags: <defaults>
</compile_context>

<pallas_src>
import jax
import jax.numpy as jnp
from jax.experimental import pallas as pl
from jax.experimental.pallas import tpu as pltpu


def _round_up(n, m):
    return ((n + m - 1) // m) * m


def _leaky_relu(v, negative_slope=0.2):
    return jnp.where(v >= 0, v, negative_slope * v)


def _make_pathway_kernel(n_hidden):
    """Kernel body: n_hidden (Linear -> LeakyReLU) MXU stages followed by the
    final Linear(., 1) -> LeakyReLU done as a VPU multiply + lane reduction."""

    def kernel(*refs):
        x_ref = refs[0]
        w_refs = refs[1:1 + n_hidden]
        w_last_ref = refs[1 + n_hidden]          # (1, K) row vector
        o_ref = refs[2 + n_hidden]

        h = x_ref[...]                           # (TB, in_dim) f32
        for w_ref in w_refs:
            h = _leaky_relu(jnp.dot(h, w_ref[...],
                                    preferred_element_type=jnp.float32))
            # Dropout(0.5) in eval mode is identity -> no-op here.

        # Final projection to 1 output: elementwise multiply (VPU) + cross-lane
        # sum (XLU) instead of an N=1 MXU matmul.
        col = jnp.sum(h * w_last_ref[...], axis=-1, keepdims=True)   # (TB, 1)
        o_ref[...] = _leaky_relu(col).astype(o_ref.dtype)

    return kernel


def _prepare_weights(weights, lane_pad=128):
    """weights: list of pre-transposed (in_features, out_features) matrices,
    last one with out_features == 1.  Returns (hidden_ws_padded, w_last_row):
    hidden widths zero-padded to a multiple of `lane_pad`, final projection as
    a (1, K_padded) row vector."""
    ws = [jnp.asarray(w, jnp.float32) for w in weights]
    *hidden_ws, w_last = ws
    assert w_last.shape[-1] == 1, "last weight must project to a single output"

    padded = []
    prev_pad = hidden_ws[0].shape[0] if hidden_ws else w_last.shape[0]
    for w in hidden_ws:
        k, n = w.shape
        n_p = _round_up(n, lane_pad)
        w_p = jnp.zeros((prev_pad, n_p), jnp.float32).at[:k, :n].set(w)
        padded.append(w_p)
        prev_pad = n_p

    k = w_last.shape[0]
    w_row = jnp.zeros((1, prev_pad), jnp.float32).at[0, :k].set(w_last[:, 0])
    return padded, w_row


def pathwayblock_forward(x, weights, *, block_rows=512):
    """
    x:       (batch, input_dim) float32
    weights: list of pre-transposed Linear weights, each (in_features, out_features);
             the last has out_features == 1 (as produced by make_pathwayblock_params).
    returns: (batch, 1) float32
    """
    x = jnp.asarray(x, jnp.float32)
    batch, in_dim = x.shape
    hidden_ws, w_row = _prepare_weights(weights)
    n_hidden = len(hidden_ws)

    # Batch tiling: largest tile up to block_rows, multiple of 8 (sublane rule);
    # pad the batch to a whole number of tiles (padded rows are sliced off).
    tb = _round_up(min(block_rows, _round_up(batch, 8)), 8)
    padded_batch = _round_up(batch, tb)
    if padded_batch != batch:
        x = jnp.pad(x, ((0, padded_batch - batch), (0, 0)))
    grid = (padded_batch // tb,)

    kernel = _make_pathway_kernel(n_hidden)

    in_specs = [pl.BlockSpec((tb, in_dim), lambda i: (i, 0))]
    for w in hidden_ws:
        in_specs.append(pl.BlockSpec(w.shape, lambda i: (0, 0)))   # resident
    in_specs.append(pl.BlockSpec(w_row.shape, lambda i: (0, 0)))   # resident
    out_specs = pl.BlockSpec((tb, 1), lambda i: (i, 0))

    # Advisory cost estimate for XLA scheduling around this call.
    flops = 2 * padded_batch * w_row.shape[1]
    for w in hidden_ws:
        flops += 2 * padded_batch * w.shape[0] * w.shape[1]
    bytes_accessed = 4 * (x.size + sum(w.size for w in hidden_ws)
                          + w_row.size + padded_batch)

    # VMEM budget: double-buffered x/out + resident weights + activation chain,
    # with headroom; clamped to be safe on v7x (64 MiB physical VMEM).
    widths = [in_dim] + [w.shape[1] for w in hidden_ws]
    vmem_est = 4 * (2 * tb * in_dim + 2 * tb
                    + 2 * (sum(w.size for w in hidden_ws) + w_row.size)
                    + 4 * tb * max(widths))
    vmem_limit = int(min(max(2 * vmem_est, 16 * 2**20), 40 * 2**20))

    out = pl.pallas_call(
        kernel,
        out_shape=jax.ShapeDtypeStruct((padded_batch, 1), jnp.float32),
        grid=grid,
        in_specs=in_specs,
        out_specs=out_specs,
        compiler_params=pltpu.CompilerParams(
            dimension_semantics=("parallel",),
            vmem_limit_bytes=vmem_limit),
        cost_estimate=pl.CostEstimate(flops=int(flops), transcendentals=0,
                                      bytes_accessed=int(bytes_accessed)),
    )(x, *hidden_ws, w_row)

    return out[:batch]


def make_pathwayblock_params(input_dim, hidden_dim, layer_num):
    """Mirror pathwayblock.__init__ + init_weights (every Linear weight filled
    with 0.01).  Weights are returned pre-transposed as (in, out)."""
    weights = []
    if hidden_dim == 0:
        weights.append(jnp.full((input_dim, 1), 0.01, dtype=jnp.float32))
    else:
        weights.append(jnp.full((input_dim, hidden_dim), 0.01, dtype=jnp.float32))
        for _ in range(layer_num - 1):
            weights.append(jnp.full((hidden_dim, hidden_dim), 0.01, dtype=jnp.float32))
        weights.append(jnp.full((hidden_dim, 1), 0.01, dtype=jnp.float32))
    return weights


def pathwayblock_reference(x, weights):
    """Plain-JAX reference (eval-mode forward)."""
    h = x
    for w in weights:
        h = _leaky_relu(h @ w)
    return h


if __name__ == "__main__":
    key = jax.random.PRNGKey(0)
    kx, kw = jax.random.split(key)

    batch, input_dim, hidden_dim, layer_num = 200, 48, 32, 2
    x = jax.random.normal(kx, (batch, input_dim), dtype=jnp.float32)

    # Case 1: module-style deterministic weights (init_weights -> 0.01).
    w_const = make_pathwayblock_params(input_dim, hidden_dim, layer_num)
    out1 = jax.block_until_ready(pathwayblock_forward(x, w_const, block_rows=128))
    ref1 = pathwayblock_reference(x, w_const)
    assert out1.shape == (batch, 1), out1.shape
    assert jnp.allclose(out1, ref1, atol=1e-4, rtol=1e-4)

    # Case 2: random weights of the same structure (stronger numerical check).
    w_rand = [0.1 * jax.random.normal(k, w.shape, jnp.float32)
              for k, w in zip(jax.random.split(kw, len(w_const)), w_const)]
    out2 = jax.block_until_ready(pathwayblock_forward(x, w_rand, block_rows=128))
    ref2 = pathwayblock_reference(x, w_rand)
    assert jnp.allclose(out2, ref2, atol=1e-4, rtol=1e-4)

    # Case 3: hidden_dim == 0 branch (single Linear(input_dim, 1)).
    w_h0 = make_pathwayblock_params(input_dim, 0, layer_num)
    out3 = jax.block_until_ready(pathwayblock_forward(x, w_h0, block_rows=128))
    ref3 = pathwayblock_reference(x, w_h0)
    assert out3.shape == (batch, 1), out3.shape
    assert jnp.allclose(out3, ref3, atol=1e-4, rtol=1e-4)

    print("KERNEL_OK")
</pallas_src>

<mosaic_0001>
module attributes {stable_mosaic.version = 11 : i64} {
  func.func @kernel(%arg0: i32, %arg1: memref<128x48xf32, #tpu.memory_space<vmem>>, %arg2: memref<48x128xf32, #tpu.memory_space<vmem>>, %arg3: memref<128x128xf32, #tpu.memory_space<vmem>>, %arg4: memref<1x128xf32, #tpu.memory_space<vmem>>, %arg5: memref<128x1xf32, #tpu.memory_space<vmem>>) attributes {dimension_semantics = [#tpu.dimension_semantics<parallel>], iteration_bounds = array<i64: 2>, scalar_prefetch = 0 : i64, scratch_operands = 0 : i64, tpu.core_type = #tpu.core_type<tc>, window_params = [{transform_indices = @transform_0, window_bounds = array<i64: 128, 48>}, {pipeline_mode = #tpu.pipeline_mode<synchronous>, transform_indices = @transform_1, window_bounds = array<i64: 48, 128>}, {pipeline_mode = #tpu.pipeline_mode<synchronous>, transform_indices = @transform_2, window_bounds = array<i64: 128, 128>}, {pipeline_mode = #tpu.pipeline_mode<synchronous>, transform_indices = @transform_3, window_bounds = array<i64: 1, 128>}, {transform_indices = @transform_4, window_bounds = array<i64: 128, 1>}]} {
    %c0 = arith.constant 0 : index
    %c0_0 = arith.constant 0 : index
    %0 = vector.load %arg1[%c0, %c0_0] : memref<128x48xf32, #tpu.memory_space<vmem>>, vector<128x48xf32>
    %c0_1 = arith.constant 0 : index
    %c0_2 = arith.constant 0 : index
    %1 = vector.load %arg2[%c0_1, %c0_2] : memref<48x128xf32, #tpu.memory_space<vmem>>, vector<48x128xf32>
    %cst = arith.constant dense<0.000000e+00> : vector<128x128xf32>
    %2 = tpu.matmul %0, %1, %cst {dimension_numbers = #tpu.dot_dimension_numbers<[1], [0], [0], [1], [0, 0, 1, 1], [], []>} : vector<128x48xf32>, vector<48x128xf32>, vector<128x128xf32> -> vector<128x128xf32>
    %cst_3 = arith.constant 0.000000e+00 : f32
    %3 = vector.broadcast %cst_3 : f32 to vector<128x128xf32>
    %4 = arith.cmpf oge, %2, %3 : vector<128x128xf32>
    %cst_4 = arith.constant 2.000000e-01 : f32
    %5 = vector.broadcast %cst_4 : f32 to vector<128x128xf32>
    %6 = arith.mulf %5, %2 : vector<128x128xf32>
    %7 = arith.select %4, %2, %6 : vector<128x128xi1>, vector<128x128xf32>
    %c0_5 = arith.constant 0 : index
    %c0_6 = arith.constant 0 : index
    %8 = vector.load %arg3[%c0_5, %c0_6] : memref<128x128xf32, #tpu.memory_space<vmem>>, vector<128x128xf32>
    %cst_7 = arith.constant dense<0.000000e+00> : vector<128x128xf32>
    %9 = tpu.matmul %7, %8, %cst_7 {dimension_numbers = #tpu.dot_dimension_numbers<[1], [0], [0], [1], [0, 0, 1, 1], [], []>} : vector<128x128xf32>, vector<128x128xf32>, vector<128x128xf32> -> vector<128x128xf32>
    %cst_8 = arith.constant 0.000000e+00 : f32
    %10 = vector.broadcast %cst_8 : f32 to vector<128x128xf32>
    %11 = arith.cmpf oge, %9, %10 : vector<128x128xf32>
    %cst_9 = arith.constant 2.000000e-01 : f32
    %12 = vector.broadcast %cst_9 : f32 to vector<128x128xf32>
    %13 = arith.mulf %12, %9 : vector<128x128xf32>
    %14 = arith.select %11, %9, %13 : vector<128x128xi1>, vector<128x128xf32>
    %c0_10 = arith.constant 0 : index
    %c0_11 = arith.constant 0 : index
    %15 = vector.load %arg4[%c0_10, %c0_11] : memref<1x128xf32, #tpu.memory_space<vmem>>, vector<1x128xf32>
    %16 = vector.broadcast %15 : vector<1x128xf32> to vector<128x128xf32>
    %17 = arith.mulf %14, %16 : vector<128x128xf32>
    %cst_12 = arith.constant dense<0.000000e+00> : vector<128xf32>
    %18 = vector.multi_reduction <add>, %17, %cst_12 [1] : vector<128x128xf32> to vector<128xf32>
    %19 = vector.shape_cast %18 : vector<128xf32> to vector<128x1xf32>
    %cst_13 = arith.constant 0.000000e+00 : f32
    %20 = vector.broadcast %cst_13 : f32 to vector<128x1xf32>
    %21 = arith.cmpf oge, %19, %20 : vector<128x1xf32>
    %cst_14 = arith.constant 2.000000e-01 : f32
    %22 = vector.broadcast %cst_14 : f32 to vector<128x1xf32>
    %23 = arith.mulf %22, %19 : vector<128x1xf32>
    %24 = arith.select %21, %19, %23 : vector<128x1xi1>, vector<128x1xf32>
    %c0_15 = arith.constant 0 : index
    %c0_16 = arith.constant 0 : index
    %25 = vector.load %arg5[%c0_15, %c0_16] : memref<128x1xf32, #tpu.memory_space<vmem>>, vector<128x1xf32>
    tpu.vector_store %arg5[%c0_15, %c0_16], %24 {strides = array<i32>} : memref<128x1xf32, #tpu.memory_space<vmem>>, vector<128x1xf32>,
    return
  }
  func.func @transform_0(%arg0: i32) -> (i32, i32) {
    %c0_i32 = arith.constant 0 : i32
    %c0_i32_0 = arith.constant 0 : i32
    return %arg0, %c0_i32 : i32, i32
  }
  func.func @transform_1(%arg0: i32) -> (i32, i32) {
    %c0_i32 = arith.constant 0 : i32
    %c0_i32_0 = arith.constant 0 : i32
    %c0_i32_1 = arith.constant 0 : i32
    return %c0_i32, %c0_i32_0 : i32, i32
  }
  func.func @transform_2(%arg0: i32) -> (i32, i32) {
    %c0_i32 = arith.constant 0 : i32
    %c0_i32_0 = arith.constant 0 : i32
    %c0_i32_1 = arith.constant 0 : i32
    return %c0_i32, %c0_i32_0 : i32, i32
  }
  func.func @transform_3(%arg0: i32) -> (i32, i32) {
    %c0_i32 = arith.constant 0 : i32
    %c0_i32_0 = arith.constant 0 : i32
    %c0_i32_1 = arith.constant 0 : i32
    return %c0_i32, %c0_i32_0 : i32, i32
  }
  func.func @transform_4(%arg0: i32) -> (i32, i32) {
    %c0_i32 = arith.constant 0 : i32
    %c0_i32_0 = arith.constant 0 : i32
    return %arg0, %c0_i32 : i32, i32
  }
}

</mosaic_0001>

<bundles_post_ra>
// kernel: tpu_custom_call.1
= control target key start
LH: loop header
LB: loop body
LE: loop exit
PB: predicated region body
PF: predicated region fallthrough
CT: control target
= control target key end

     0   :  { %s1125_s15 = smov 0   ;;  %s1304_s0 = inlined_call_operand.vmem [shape: f32[256,48], index: 0, kind: input, shape index: {}]   ;;  %s1305_s1 = inlined_call_operand.vmem [shape: f32[48,128], index: 1, kind: input, shape index: {}]   ;;  %s1306_s2 = inlined_call_operand.vmem [shape: f32[128,128], index: 2, kind: input, shape index: {}]   ;;  %s1307_s3 = inlined_call_operand.vmem [shape: f32[1,128], index: 3, kind: input, shape index: {}]   ;;  %s1308_s4 = inlined_call_operand.vmem [shape: f32[256,1], index: 4, kind: output, shape index: {}]  }
   0x1 LB: > { %s850_s16 = sadd.s32 4294967295, %s1098_s15   ;;  %p854_p0 = scmp.ge.s32.totalorder %s1098_s15, 1  ;;  %s1098_s15 = sphi %s1125_s15, %s14_s15  }
   0x2   : > { %p163_p1 = scmp.lt.s32.totalorder %s1098_s15, 3 }
   0x4   : > { %p164_p2 = pnand %p854_p0, %p163_p1 }
   0x5   : > { %v217_v0 = vld [vmem:[%s1305_s1] sm:$0xff] (!%p164_p2)  ;;  %v218_v1 = vld [vmem:[%s1305_s1 + $0x8] sm:$0xff] (!%p164_p2)  ;;  %v219_v2 = vld [vmem:[%s1305_s1 + $0x10] sm:$0xff] (!%p164_p2)  ;;  %s855_s23 = sshll.u32 (!%p164_p2), %s850_s16, 4  ;;  %vm223_vm0 = vcmask (!%p164_p2), 392192  }
   0x6   : > { %167 = sbr.rel (%p164_p2) target bundleno = 632 (0x278), region = 36  ;;  %v1024_v3 = vpack.c.bf16 (!%p164_p2), %v218_v1, %v217_v0  ;;  %v220_v4 = vld [vmem:[%s1305_s1 + $0x18] sm:$0xff] (!%p164_p2)  ;;  %v221_v5 = vld [vmem:[%s1305_s1 + $0x20] sm:$0xff] (!%p164_p2)  ;;  %v222_v6 = vld [vmem:[%s1305_s1 + $0x28] sm:$0xff] (!%p164_p2)  ;;  %p190_p3 = scmp.lt.s32.totalorder (!%p164_p2), %s855_s23, 31 }
   0x7   : > { %v1028_v7 = vpack.c.bf16 (!%p164_p2), %v220_v4, %v219_v2  ;;  %v465_v8 = vld [vmem:[%s1306_s2] sm:$0xff] (!%p164_p2)  ;;  %v466_v9 = vld [vmem:[%s1306_s2 + $0x8] sm:$0xff] (!%p164_p2)  ;;  %v467_v10 = vld [vmem:[%s1306_s2 + $0x10] sm:$0xff] (!%p164_p2)  ;;  %v1032_v13 = vpack.c.bf16 (!%p164_p2), %v222_v6, %v221_v5 }
   0x8   : > { %1025 = vmatprep.subr.bf16.mxu0 (!%p164_p2), %v1024_v3  ;;  %v1036_v11 = vpack.c.bf16 (!%p164_p2), %v466_v9, %v465_v8  ;;  %v468_v12 = vld [vmem:[%s1306_s2 + $0x18] sm:$0xff] (!%p164_p2)  ;;  %v469_v15 = vld [vmem:[%s1306_s2 + $0x20] sm:$0xff] (!%p164_p2)  ;;  %v470_v16 = vld [vmem:[%s1306_s2 + $0x28] sm:$0xff] (!%p164_p2) }
   0x9   : > { %1027 = vmatpush3.bf16.msra.mxu0 (!%p164_p2), %v1024_v3  ;;  %v1040_v14 = vpack.c.bf16 (!%p164_p2), %v468_v12, %v467_v10  ;;  %v1044_v18 = vpack.c.bf16 (!%p164_p2), %v470_v16, %v469_v15  ;;  %v471_v19 = vld [vmem:[%s1306_s2 + $0x30] sm:$0xff] (!%p164_p2)  ;;  %v472_v20 = vld [vmem:[%s1306_s2 + $0x38] sm:$0xff] (!%p164_p2)  ;;  %v473_v24 = vld [vmem:[%s1306_s2 + $0x40] sm:$0xff] (!%p164_p2) }
   0xa   : > { %1029 = vmatprep.subr.bf16.mxu0 (!%p164_p2), %v1028_v7  ;;  %1068 = vmatprep.subr.bf16.mxu1 (!%p164_p2), %v1036_v11  ;;  %v1048_v23 = vpack.c.bf16 (!%p164_p2), %v472_v20, %v471_v19  ;;  %v474_v25 = vld [vmem:[%s1306_s2 + $0x48] sm:$0xff] (!%p164_p2)  ;;  %v475_v29 = vld [vmem:[%s1306_s2 + $0x50] sm:$0xff] (!%p164_p2)  ;;  %v476_v30 = vld [vmem:[%s1306_s2 + $0x58] sm:$0xff] (!%p164_p2) }
   0xb   : > { %1076 = vmatpush3.bf16.msra.mxu1 (!%p164_p2), %v1036_v11  ;;  %v1052_v28 = vpack.c.bf16 (!%p164_p2), %v474_v25, %v473_v24  ;;  %v1056_v33 = vpack.c.bf16 (!%p164_p2), %v476_v30, %v475_v29  ;;  %v477_v34 = vld [vmem:[%s1306_s2 + $0x60] sm:$0xff] (!%p164_p2)  ;;  %v478_v35 = vld [vmem:[%s1306_s2 + $0x68] sm:$0xff] (!%p164_p2)  ;;  %v479_v46 = vld [vmem:[%s1306_s2 + $0x70] sm:$0xff] (!%p164_p2) }
   0xc   : > { %1069 = vmatprep.subr.bf16.mxu1 (!%p164_p2), %v1040_v14  ;;  %v1060_v38 = vpack.c.bf16 (!%p164_p2), %v478_v35, %v477_v34  ;;  %v480_v47 = vld [vmem:[%s1306_s2 + $0x78] sm:$0xff] (!%p164_p2) }
   0xd   : > { %s1310_s23 = smov (!%p190_p3, %s855_s23), 31  ;;  %1031 = vmatpush3.bf16.msra.mxu0 %v1028_v7  ;;  %v1064_v48 = vpack.c.bf16 %v480_v47, %v479_v46 }
   0xe   : > { %s856_s12 = sshll.u32 %s1310_s23, 3  ;;  %1033 = vmatprep.subr.bf16.mxu0 %v1032_v13 }
   0xf   : > { %s1171_s16 = scalar_lea.vmem %s1304_s0, %s856_s12  ;;  %1077 = vmatpush3.bf16.msra.mxu1 %v1040_v14  ;;  %s1267_s22 = scalar_lea.vmem %s1308_s4, %s856_s12 }
  0x10   : > { %v201_v17 = vld [vmem:[%s1171_s16] sm:$0xff]  ;;  %1070 = vmatprep.subr.bf16.mxu1 %v1044_v18  ;;  %v202_v21 = vld [vmem:[%s1171_s16 + $0x8] sm:$0xff]  ;;  %v203_v22 = vld [vmem:[%s1171_s16 + $0x10] sm:$0xff] }
  0x11   : > { %944 = vmatprep.mubr.msk.f32.mxu0 %vm223_vm0, %v201_v17  ;;  %1035 = vmatpush3.bf16.msra.mxu0 %v1032_v13  ;;  %v204_v26 = vld [vmem:[%s1171_s16 + $0x18] sm:$0xff]  ;;  %v205_v27 = vld [vmem:[%s1171_s16 + $0x20] sm:$0xff]  ;;  %v206_v31 = vld [vmem:[%s1171_s16 + $0x28] sm:$0xff] }
  0x12   : > { %1037 = vmatprep.subr.bf16.mxu0 %v1036_v11  ;;  %v207_v32 = vld [vmem:[%s1171_s16 + $0x30] sm:$0xff]  ;;  %v208_v36 = vld [vmem:[%s1171_s16 + $0x38] sm:$0xff]  ;;  %v209_v37 = vld [vmem:[%s1171_s16 + $0x40] sm:$0xff] }
  0x13   : > { %1078 = vmatpush3.bf16.msra.mxu1 %v1044_v18  ;;  %v210_v39 = vld [vmem:[%s1171_s16 + $0x48] sm:$0xff]  ;;  %v211_v40 = vld [vmem:[%s1171_s16 + $0x50] sm:$0xff]  ;;  %v212_v41 = vld [vmem:[%s1171_s16 + $0x58] sm:$0xff] }
  0x14   : > { %945 = vmatmul.mubr.msk.f32.vlgmr.msra.gmra.mrb[0].mxu0 %vm223_vm0, %v202_v21  ;;  %1071 = vmatprep.subr.bf16.mxu1 %v1048_v23  ;;  %v213_v42 = vld [vmem:[%s1171_s16 + $0x60] sm:$0xff]  ;;  %v214_v43 = vld [vmem:[%s1171_s16 + $0x68] sm:$0xff]  ;;  %v215_v44 = vld [vmem:[%s1171_s16 + $0x70] sm:$0xff] }
  0x15   : > { %947 = vmatprep.mubr.msk.f32.mxu0 %vm223_vm0, %v203_v22  ;;  %1039 = vmatpush3.bf16.msra.mxu0 %v1036_v11  ;;  %v216_v45 = vld [vmem:[%s1171_s16 + $0x78] sm:$0xff] }
  0x16   : > { %1041 = vmatprep.subr.bf16.mxu0 %v1040_v14 }
  0x17   : > { %1079 = vmatpush3.bf16.msra.mxu1 %v1048_v23 }
  0x18   : > { %948 = vmatmul.mubr.msk.f32.gmra.mrb[2].mxu0 %vm223_vm0, %v204_v26  ;;  %1072 = vmatprep.subr.bf16.mxu1 %v1052_v28 }
  0x19   : > { %950 = vmatprep.mubr.msk.f32.mxu0 %vm223_vm0, %v205_v27  ;;  %1043 = vmatpush3.bf16.msra.mxu0 %v1040_v14 }
  0x1a   : > { %1045 = vmatprep.subr.bf16.mxu0 %v1044_v18 }
  0x1b   : > { %1080 = vmatpush3.bf16.msra.mxu1 %v1052_v28 }
  0x1c   : > { %951 = vmatmul.mubr.msk.f32.gmra.mrb[4].mxu0 %vm223_vm0, %v206_v31  ;;  %1073 = vmatprep.subr.bf16.mxu1 %v1056_v33 }
  0x1d   : > { %953 = vmatprep.mubr.msk.f32.mxu0 %vm223_vm0, %v207_v32  ;;  %1047 = vmatpush3.bf16.msra.mxu0 %v1044_v18 }
  0x1e   : > { %1049 = vmatprep.subr.bf16.mxu0 %v1048_v23 }
  0x1f   : > { %1081 = vmatpush3.bf16.msra.mxu1 %v1056_v33 }
  0x20   : > { %954 = vmatmul.mubr.msk.f32.gmra.mrb[6].mxu0 %vm223_vm0, %v208_v36  ;;  %1074 = vmatprep.subr.bf16.mxu1 %v1060_v38  ;;  %v1244_v36 = vld [vmem:[%s1307_s3] ss:$0 sm:$0xff] }
  0x21   : > { %956 = vmatprep.mubr.msk.f32.mxu0 %vm223_vm0, %v209_v37  ;;  %1051 = vmatpush3.bf16.msra.mxu0 %v1048_v23 }
  0x22   : > { %1053 = vmatprep.subr.bf16.mxu0 %v1052_v28 }
  0x23   : > { %1082 = vmatpush3.bf16.msra.mxu1 %v1060_v38 }
  0x24   : > { %957 = vmatmul.mubr.msk.f32.gmra.mrb[8].mxu0 %vm223_vm0, %v210_v39  ;;  %1075 = vmatprep.subr.bf16.mxu1 %v1064_v48 }
  0x25   : > { %959 = vmatprep.mubr.msk.f32.mxu0 %vm223_vm0, %v211_v40  ;;  %1055 = vmatpush3.bf16.msra.mxu0 %v1052_v28 }
  0x26   : > { %1057 = vmatprep.subr.bf16.mxu0 %v1056_v33 }
  0x27   : > { %1083 = vmatpush3.bf16.msra.mxu1 %v1064_v48 }
  0x28   : > { %960 = vmatmul.mubr.msk.f32.gmra.mrb[10].mxu0 %vm223_vm0, %v212_v41 }
  0x29   : > { %962 = vmatprep.mubr.msk.f32.mxu0 %vm223_vm0, %v213_v42  ;;  %1059 = vmatpush3.bf16.msra.mxu0 %v1056_v33 }
  0x2a   : > { %1061 = vmatprep.subr.bf16.mxu0 %v1060_v38 }
  0x2c   : > { %963 = vmatmul.mubr.msk.f32.gmra.mrb[12].mxu0 %vm223_vm0, %v214_v43 }
  0x2d   : > { %965 = vmatprep.mubr.msk.f32.mxu0 %vm223_vm0, %v215_v44  ;;  %1063 = vmatpush3.bf16.msra.mxu0 %v1060_v38 }
  0x2e   : > { %1065 = vmatprep.subr.bf16.mxu0 %v1064_v48 }
  0x30   : > { %966 = vmatmul.mubr.msk.f32.gmra.mrb[14].mxu0 %vm223_vm0, %v216_v45 }
  0x31   : > { %1067 = vmatpush3.bf16.msra.mxu0 %v1064_v48 }
  0xe7   : > { %v946_v49 = vpop.f32.mrb[0].mxu0 }
  0xe8   : > { %v434_v50 = vmul.f32 0.2, %v946_v49  ;;  %v338_v51 = vpop.f32.mrb[1].mxu0  ;;  %vm418_vm1 = vcmp.ge.f32.partialorder %v946_v49, 0.0 }
  0xe9   : > { %vm417_vm2 = vcmp.ge.f32.partialorder %v338_v51, 0.0  ;;  %v433_v52 = vmul.f32 0.2, %v338_v51 }
  0xea   : > { %v450_v55 = vsel %vm418_vm1, %v946_v49, %v434_v50 }
  0xeb   : > { %v949_v53 = vpop.f32.mrb[2].mxu0  ;;  %v449_v54 = vsel %vm417_vm2, %v338_v51, %v433_v52 }
  0xec   : > { %v436_v56 = vmul.f32 0.2, %v949_v53  ;;  %v348_v57 = vpop.f32.mrb[3].mxu0  ;;  %1000 = vmatprep.mubr.f32.mxu0 %v449_v54  ;;  %vm420_vm3 = vcmp.ge.f32.partialorder %v949_v53, 0.0 }
  0xed   : > { %vm419_vm4 = vcmp.ge.f32.partialorder %v348_v57, 0.0  ;;  %v435_v58 = vmul.f32 0.2, %v348_v57  ;;  %1001 = vmatmul.mubr.f32.vlgmr.msra.gmra.mrb[16].mxu0 %v450_v55 }
  0xee   : > { %v452_v63 = vsel %vm420_vm3, %v949_v53, %v436_v56 }
  0xef   : > { %v952_v59 = vpop.f32.mrb[4].mxu0  ;;  %v451_v60 = vsel %vm419_vm4, %v348_v57, %v435_v58 }
  0xf0   : > { %vm422_vm5 = vcmp.ge.f32.partialorder %v952_v59, 0.0  ;;  %v438_v61 = vmul.f32 0.2, %v952_v59  ;;  %v358_v62 = vpop.f32.mrb[5].mxu0  ;;  %1003 = vmatprep.mubr.f32.mxu0 %v451_v60 }
  0xf1   : > { %v437_v0 = vmul.f32 0.2, %v358_v62  ;;  %1004 = vmatmul.mubr.f32.gmra.mrb[18].mxu0 %v452_v63  ;;  %vm421_vm6 = vcmp.ge.f32.partialorder %v358_v62, 0.0 }
  0xf2   : > { %v454_v1 = vsel %vm422_vm5, %v952_v59, %v438_v61 }
  0xf3   : > { %v955_v2 = vpop.f32.mrb[6].mxu0  ;;  %v453_v3 = vsel %vm421_vm6, %v358_v62, %v437_v0 }
  0xf4   : > { %vm424_vm7 = vcmp.ge.f32.partialorder %v955_v2, 0.0  ;;  %v440_v4 = vmul.f32 0.2, %v955_v2  ;;  %v368_v5 = vpop.f32.mrb[7].mxu0  ;;  %1006 = vmatprep.mubr.f32.mxu1 %v453_v3 }
  0xf5   : > { %vm423_vm8 = vcmp.ge.f32.partialorder %v368_v5, 0.0  ;;  %v439_v6 = vmul.f32 0.2, %v368_v5  ;;  %1007 = vmatmul.mubr.f32.vlgmr.msra.gmra.mrb[0].mxu1 %v454_v1 }
  0xf6   : > { %v456_v7 = vsel %vm424_vm7, %v955_v2, %v440_v4 }
  0xf7   : > { %v958_v8 = vpop.f32.mrb[8].mxu0  ;;  %v455_v9 = vsel %vm423_vm8, %v368_v5, %v439_v6 }
  0xf8   : > { %vm426_vm9 = vcmp.ge.f32.partialorder %v958_v8, 0.0  ;;  %v442_v10 = vmul.f32 0.2, %v958_v8  ;;  %v378_v11 = vpop.f32.mrb[9].mxu0  ;;  %1009 = vmatprep.mubr.f32.mxu1 %v455_v9 }
  0xf9   : > { %vm425_vm10 = vcmp.ge.f32.partialorder %v378_v11, 0.0  ;;  %v441_v12 = vmul.f32 0.2, %v378_v11  ;;  %1010 = vmatmul.mubr.f32.gmra.mrb[2].mxu1 %v456_v7 }
  0xfa   : > { %v458_v13 = vsel %vm426_vm9, %v958_v8, %v442_v10 }
  0xfb   : > { %v961_v14 = vpop.f32.mrb[10].mxu0  ;;  %v457_v15 = vsel %vm425_vm10, %v378_v11, %v441_v12 }
  0xfc   : > { %vm428_vm11 = vcmp.ge.f32.partialorder %v961_v14, 0.0  ;;  %v444_v16 = vmul.f32 0.2, %v961_v14  ;;  %v388_v17 = vpop.f32.mrb[11].mxu0  ;;  %1012 = vmatprep.mubr.f32.mxu1 %v457_v15 }
  0xfd   : > { %vm427_vm12 = vcmp.ge.f32.partialorder %v388_v17, 0.0  ;;  %v443_v18 = vmul.f32 0.2, %v388_v17  ;;  %1013 = vmatmul.mubr.f32.gmra.mrb[4].mxu1 %v458_v13 }
  0xfe   : > { %v460_v19 = vsel %vm428_vm11, %v961_v14, %v444_v16 }
  0xff   : > { %v964_v20 = vpop.f32.mrb[12].mxu0  ;;  %v459_v21 = vsel %vm427_vm12, %v388_v17, %v443_v18 }
 0x100   : > { %vm430_vm13 = vcmp.ge.f32.partialorder %v964_v20, 0.0  ;;  %v446_v22 = vmul.f32 0.2, %v964_v20  ;;  %v398_v23 = vpop.f32.mrb[13].mxu0  ;;  %1015 = vmatprep.mubr.f32.mxu1 %v459_v21 }
 0x101   : > { %vm429_vm14 = vcmp.ge.f32.partialorder %v398_v23, 0.0  ;;  %v445_v24 = vmul.f32 0.2, %v398_v23  ;;  %1016 = vmatmul.mubr.f32.gmra.mrb[6].mxu1 %v460_v19 }
 0x102   : > { %v462_v25 = vsel %vm430_vm13, %v964_v20, %v446_v22 }
 0x103   : > { %v967_v26 = vpop.f32.mrb[14].mxu0  ;;  %v461_v27 = vsel %vm429_vm14, %v398_v23, %v445_v24 }
 0x104   : > { %vm432_vm15 = vcmp.ge.f32.partialorder %v967_v26, 0.0  ;;  %v448_v28 = vmul.f32 0.2, %v967_v26  ;;  %v408_v29 = vpop.f32.mrb[15].mxu0  ;;  %1018 = vmatprep.mubr.f32.mxu1 %v461_v27 }
 0x105   : > { %vm431_vm0 = vcmp.ge.f32.partialorder %v408_v29, 0.0  ;;  %v447_v30 = vmul.f32 0.2, %v408_v29  ;;  %1019 = vmatmul.mubr.f32.gmra.mrb[8].mxu1 %v462_v25 }
 0x106   : > { %v464_v31 = vsel %vm432_vm15, %v967_v26, %v448_v28 }
 0x107   : > { %v463_v32 = vsel %vm431_vm0, %v408_v29, %v447_v30 }
 0x108   : > { %1021 = vmatprep.mubr.f32.mxu1 %v463_v32 }
 0x109   : > { %1022 = vmatmul.mubr.f32.gmra.mrb[10].mxu1 %v464_v31 }
 0x1c0   : > { %v1002_v33 = vpop.f32.mrb[16].mxu0 }
 0x1c1   : > { %v643_v34 = vmul.f32 0.2, %v1002_v33  ;;  %v547_v35 = vpop.f32.mrb[17].mxu0  ;;  %vm627_vm1 = vcmp.ge.f32.partialorder %v1002_v33, 0.0 }
 0x1c2   : > { %vm626_vm2 = vcmp.ge.f32.partialorder %v547_v35, 0.0  ;;  %v642_v37 = vmul.f32 0.2, %v547_v35 }
 0x1c3   : > { %v659_v38 = vsel %vm627_vm1, %v1002_v33, %v643_v34  ;;  %vm777_vm1 = vcmask 7168  }
 0x1c4   : > { %v1005_v39 = vpop.f32.mrb[18].mxu0  ;;  %v682_v40 = vmul.f32 %v1244_v36, %v659_v38  ;;  %v658_v43 = vsel %vm626_vm2, %v547_v35, %v642_v37 }
 0x1c5   : > { %v645_v41 = vmul.f32 0.2, %v1005_v39  ;;  %v557_v42 = vpop.f32.mrb[19].mxu0  ;;  %vm629_vm3 = vcmp.ge.f32.partialorder %v1005_v39, 0.0  ;;  %v681_v47 = vmul.f32 %v1244_v36, %v658_v43 }
 0x1c6   : > { %vm628_vm4 = vcmp.ge.f32.partialorder %v557_v42, 0.0  ;;  %v644_v44 = vmul.f32 0.2, %v557_v42  ;;  %699 = vadd.xlane.f32.xlu0 %v682_v40 }
 0x1c7   : > { %v661_v45 = vsel %vm629_vm3, %v1005_v39, %v645_v41 }
 0x1c8   : > { %v1008_v46 = vpop.f32.mrb[0].mxu1  ;;  %v684_v48 = vmul.f32 %v1244_v36, %v661_v45  ;;  %v660_v49 = vsel %vm628_vm4, %v557_v42, %v644_v44 }
 0x1c9   : > { %v647_v50 = vmul.f32 0.2, %v1008_v46  ;;  %v567_v51 = vpop.f32.mrb[1].mxu1  ;;  %vm631_vm5 = vcmp.ge.f32.partialorder %v1008_v46, 0.0  ;;  %v683_v54 = vmul.f32 %v1244_v36, %v660_v49 }
 0x1ca   : > { %vm630_vm6 = vcmp.ge.f32.partialorder %v567_v51, 0.0  ;;  %v646_v52 = vmul.f32 0.2, %v567_v51  ;;  %697 = vadd.xlane.f32.xlu0 %v681_v47  ;;  %703 = vadd.xlane.f32.xlu1 %v684_v48 }
 0x1cb   : > { %v663_v59 = vsel %vm631_vm5, %v1008_v46, %v647_v50 }
 0x1cc   : > { %v1011_v53 = vpop.f32.mrb[2].mxu1  ;;  %v662_v55 = vsel %vm630_vm6, %v567_v51, %v646_v52  ;;  %v686_v62 = vmul.f32 %v1244_v36, %v663_v59 }
 0x1cd   : > { %v649_v56 = vmul.f32 0.2, %v1011_v53  ;;  %v577_v57 = vpop.f32.mrb[3].mxu1  ;;  %v685_v58 = vmul.f32 %v1244_v36, %v662_v55  ;;  %vm633_vm7 = vcmp.ge.f32.partialorder %v1011_v53, 0.0 }
 0x1ce   : > { %vm632_vm8 = vcmp.ge.f32.partialorder %v577_v57, 0.0  ;;  %v648_v60 = vmul.f32 0.2, %v577_v57  ;;  %701 = vadd.xlane.f32.xlu1 %v683_v54 }
 0x1cf   : > { %705 = vadd.xlane.f32.xlu0 %v685_v58  ;;  %v665_v3 = vsel %vm633_vm7, %v1011_v53, %v649_v56 }
 0x1d0   : > { %v1014_v61 = vpop.f32.mrb[4].mxu1  ;;  %v664_v63 = vsel %vm632_vm8, %v577_v57, %v648_v60  ;;  %v688_v6 = vmul.f32 %v1244_v36, %v665_v3 }
 0x1d1   : > { %v651_v0 = vmul.f32 0.2, %v1014_v61  ;;  %v587_v1 = vpop.f32.mrb[5].mxu1  ;;  %v687_v2 = vmul.f32 %v1244_v36, %v664_v63  ;;  %vm635_vm9 = vcmp.ge.f32.partialorder %v1014_v61, 0.0 }
 0x1d2   : > { %vm634_vm10 = vcmp.ge.f32.partialorder %v587_v1, 0.0  ;;  %v650_v4 = vmul.f32 0.2, %v587_v1  ;;  %707 = vadd.xlane.f32.xlu1 %v686_v62 }
 0x1d3   : > { %709 = vadd.xlane.f32.xlu0 %v687_v2  ;;  %v667_v11 = vsel %vm635_vm9, %v1014_v61, %v651_v0 }
 0x1d4   : > { %v1017_v5 = vpop.f32.mrb[6].mxu1  ;;  %v666_v7 = vsel %vm634_vm10, %v587_v1, %v650_v4  ;;  %v690_v14 = vmul.f32 %v1244_v36, %v667_v11 }
 0x1d5   : > { %v653_v8 = vmul.f32 0.2, %v1017_v5  ;;  %v597_v9 = vpop.f32.mrb[7].mxu1  ;;  %v689_v10 = vmul.f32 %v1244_v36, %v666_v7  ;;  %vm637_vm11 = vcmp.ge.f32.partialorder %v1017_v5, 0.0 }
 0x1d6   : > { %vm636_vm12 = vcmp.ge.f32.partialorder %v597_v9, 0.0  ;;  %v652_v12 = vmul.f32 0.2, %v597_v9  ;;  %711 = vadd.xlane.f32.xlu1 %v688_v6 }
 0x1d7   : > { %713 = vadd.xlane.f32.xlu0 %v689_v10  ;;  %v669_v19 = vsel %vm637_vm11, %v1017_v5, %v653_v8 }
 0x1d8   : > { %v1020_v13 = vpop.f32.mrb[8].mxu1  ;;  %v668_v15 = vsel %vm636_vm12, %v597_v9, %v652_v12  ;;  %v692_v22 = vmul.f32 %v1244_v36, %v669_v19 }
 0x1d9   : > { %v655_v16 = vmul.f32 0.2, %v1020_v13  ;;  %v607_v17 = vpop.f32.mrb[9].mxu1  ;;  %v691_v18 = vmul.f32 %v1244_v36, %v668_v15  ;;  %vm639_vm13 = vcmp.ge.f32.partialorder %v1020_v13, 0.0 }
 0x1da   : > { %vm638_vm14 = vcmp.ge.f32.partialorder %v607_v17, 0.0  ;;  %v654_v20 = vmul.f32 0.2, %v607_v17  ;;  %715 = vadd.xlane.f32.xlu1 %v690_v14 }
 0x1db   : > { %717 = vadd.xlane.f32.xlu0 %v691_v18  ;;  %v671_v27 = vsel %vm639_vm13, %v1020_v13, %v655_v16 }
 0x1dc   : > { %v1023_v21 = vpop.f32.mrb[10].mxu1  ;;  %v670_v23 = vsel %vm638_vm14, %v607_v17, %v654_v20  ;;  %v694_v30 = vmul.f32 %v1244_v36, %v671_v27 }
 0x1dd   : > { %v657_v24 = vmul.f32 0.2, %v1023_v21  ;;  %v617_v25 = vpop.f32.mrb[11].mxu1  ;;  %v693_v26 = vmul.f32 %v1244_v36, %v670_v23  ;;  %vm641_vm15 = vcmp.ge.f32.partialorder %v1023_v21, 0.0 }
 0x1de   : > { %vm640_vm0 = vcmp.ge.f32.partialorder %v617_v25, 0.0  ;;  %v656_v28 = vmul.f32 0.2, %v617_v25  ;;  %719 = vadd.xlane.f32.xlu1 %v692_v22 }
 0x1df   : > { %721 = vadd.xlane.f32.xlu0 %v693_v26  ;;  %v673_v32 = vsel %vm641_vm15, %v1023_v21, %v657_v24 }
 0x1e0   : > { %v672_v29 = vsel %vm640_vm0, %v617_v25, %v656_v28  ;;  %v696_v33 = vmul.f32 %v1244_v36, %v673_v32 }
 0x1e1   : > { %v695_v31 = vmul.f32 %v1244_v36, %v672_v29 }
 0x1e2   : > { %723 = vadd.xlane.f32.xlu1 %v694_v30 }
 0x1e3   : > { %725 = vadd.xlane.f32.xlu0 %v695_v31 }
 0x1e6   : > { %727 = vadd.xlane.f32.xlu1 %v696_v33 }
 0x253   : > { %v700_v34 = vpop.xlane.xlu0 %699 }
 0x254   : > { %vm730_vm2 = vcmp.ge.f32.partialorder %v700_v34, 0.0  ;;  %v746_v35 = vmul.f32 0.2, %v700_v34 }
 0x256   : > { %v762_v37 = vsel %vm730_vm2, %v700_v34, %v746_v35 }
 0x257   : > { %779 = vst.msk [vmem:[%s1267_s22 + $0x8] sm:$0xff] %vm777_vm1, %v762_v37  ;;  %v698_v38 = vpop.xlane.xlu0 %697  ;;  %v704_v39 = vpop.xlane.xlu1 %703 }
 0x258   : > { %vm729_vm3 = vcmp.ge.f32.partialorder %v698_v38, 0.0  ;;  %v745_v36 = vmul.f32 0.2, %v698_v38  ;;  %vm732_vm4 = vcmp.ge.f32.partialorder %v704_v39, 0.0  ;;  %v748_v40 = vmul.f32 0.2, %v704_v39 }
 0x25a   : > { %v761_v41 = vsel %vm729_vm3, %v698_v38, %v745_v36  ;;  %v764_v42 = vsel %vm732_vm4, %v704_v39, %v748_v40 }
 0x25b   : > { %778 = vst.msk [vmem:[%s1267_s22] sm:$0xff] %vm777_vm1, %v761_v41  ;;  %781 = vst.msk [vmem:[%s1267_s22 + $0x18] sm:$0xff] %vm777_vm1, %v764_v42  ;;  %v702_v43 = vpop.xlane.xlu1 %701 }
 0x25c   : > { %vm731_vm5 = vcmp.ge.f32.partialorder %v702_v43, 0.0  ;;  %v747_v44 = vmul.f32 0.2, %v702_v43  ;;  %v706_v45 = vpop.xlane.xlu0 %705 }
 0x25d   : > { %vm733_vm6 = vcmp.ge.f32.partialorder %v706_v45, 0.0  ;;  %v749_v46 = vmul.f32 0.2, %v706_v45 }
 0x25e   : > { %v763_v47 = vsel %vm731_vm5, %v702_v43, %v747_v44 }
 0x25f   : > { %780 = vst.msk [vmem:[%s1267_s22 + $0x10] sm:$0xff] %vm777_vm1, %v763_v47  ;;  %v765_v48 = vsel %vm733_vm6, %v706_v45, %v749_v46  ;;  %v708_v49 = vpop.xlane.xlu1 %707 }
 0x260   : > { %782 = vst.msk [vmem:[%s1267_s22 + $0x20] sm:$0xff] %vm777_vm1, %v765_v48  ;;  %vm734_vm7 = vcmp.ge.f32.partialorder %v708_v49, 0.0  ;;  %v750_v50 = vmul.f32 0.2, %v708_v49  ;;  %v710_v51 = vpop.xlane.xlu0 %709 }
 0x261   : > { %vm735_vm8 = vcmp.ge.f32.partialorder %v710_v51, 0.0  ;;  %v751_v52 = vmul.f32 0.2, %v710_v51 }
 0x262   : > { %v766_v53 = vsel %vm734_vm7, %v708_v49, %v750_v50 }
 0x263   : > { %783 = vst.msk [vmem:[%s1267_s22 + $0x28] sm:$0xff] %vm777_vm1, %v766_v53  ;;  %v767_v54 = vsel %vm735_vm8, %v710_v51, %v751_v52  ;;  %v712_v55 = vpop.xlane.xlu1 %711 }
 0x264   : > { %784 = vst.msk [vmem:[%s1267_s22 + $0x30] sm:$0xff] %vm777_vm1, %v767_v54  ;;  %vm736_vm9 = vcmp.ge.f32.partialorder %v712_v55, 0.0  ;;  %v752_v56 = vmul.f32 0.2, %v712_v55  ;;  %v714_v57 = vpop.xlane.xlu0 %713 }
 0x265   : > { %vm737_vm10 = vcmp.ge.f32.partialorder %v714_v57, 0.0  ;;  %v753_v58 = vmul.f32 0.2, %v714_v57 }
 0x266   : > { %v768_v59 = vsel %vm736_vm9, %v712_v55, %v752_v56 }
 0x267   : > { %785 = vst.msk [vmem:[%s1267_s22 + $0x38] sm:$0xff] %vm777_vm1, %v768_v59  ;;  %v769_v60 = vsel %vm737_vm10, %v714_v57, %v753_v58  ;;  %v716_v61 = vpop.xlane.xlu1 %715 }
 0x268   : > { %786 = vst.msk [vmem:[%s1267_s22 + $0x40] sm:$0xff] %vm777_vm1, %v769_v60  ;;  %vm738_vm11 = vcmp.ge.f32.partialorder %v716_v61, 0.0  ;;  %v754_v62 = vmul.f32 0.2, %v716_v61  ;;  %v718_v63 = vpop.xlane.xlu0 %717 }
 0x269   : > { %vm739_vm12 = vcmp.ge.f32.partialorder %v718_v63, 0.0  ;;  %v755_v0 = vmul.f32 0.2, %v718_v63 }
 0x26a   : > { %v770_v1 = vsel %vm738_vm11, %v716_v61, %v754_v62 }
 0x26b   : > { %787 = vst.msk [vmem:[%s1267_s22 + $0x48] sm:$0xff] %vm777_vm1, %v770_v1  ;;  %v771_v2 = vsel %vm739_vm12, %v718_v63, %v755_v0  ;;  %v720_v3 = vpop.xlane.xlu1 %719 }
 0x26c   : > { %788 = vst.msk [vmem:[%s1267_s22 + $0x50] sm:$0xff] %vm777_vm1, %v771_v2  ;;  %vm740_vm13 = vcmp.ge.f32.partialorder %v720_v3, 0.0  ;;  %v756_v4 = vmul.f32 0.2, %v720_v3  ;;  %v722_v5 = vpop.xlane.xlu0 %721 }
 0x26d   : > { %vm741_vm14 = vcmp.ge.f32.partialorder %v722_v5, 0.0  ;;  %v757_v6 = vmul.f32 0.2, %v722_v5 }
 0x26e   : > { %v772_v7 = vsel %vm740_vm13, %v720_v3, %v756_v4 }
 0x26f   : > { %789 = vst.msk [vmem:[%s1267_s22 + $0x58] sm:$0xff] %vm777_vm1, %v772_v7  ;;  %v773_v8 = vsel %vm741_vm14, %v722_v5, %v757_v6  ;;  %v724_v9 = vpop.xlane.xlu1 %723 }
 0x270   : > { %790 = vst.msk [vmem:[%s1267_s22 + $0x60] sm:$0xff] %vm777_vm1, %v773_v8  ;;  %vm742_vm15 = vcmp.ge.f32.partialorder %v724_v9, 0.0  ;;  %v758_v10 = vmul.f32 0.2, %v724_v9  ;;  %v726_v11 = vpop.xlane.xlu0 %725 }
 0x271   : > { %vm743_vm0 = vcmp.ge.f32.partialorder %v726_v11, 0.0  ;;  %v759_v12 = vmul.f32 0.2, %v726_v11 }
 0x272   : > { %v774_v13 = vsel %vm742_vm15, %v724_v9, %v758_v10 }
 0x273   : > { %791 = vst.msk [vmem:[%s1267_s22 + $0x68] sm:$0xff] %vm777_vm1, %v774_v13  ;;  %v775_v14 = vsel %vm743_vm0, %v726_v11, %v759_v12  ;;  %v728_v15 = vpop.xlane.xlu1 %727 }
 0x274   : > { %792 = vst.msk [vmem:[%s1267_s22 + $0x70] sm:$0xff] %vm777_vm1, %v775_v14  ;;  %vm744_vm2 = vcmp.ge.f32.partialorder %v728_v15, 0.0  ;;  %v760_v16 = vmul.f32 0.2, %v728_v15 }
 0x276   : > { %v776_v17 = vsel %vm744_vm2, %v728_v15, %v760_v16 }
 0x277   : > { %793 = vst.msk [vmem:[%s1267_s22 + $0x78] sm:$0xff] %vm777_vm1, %v776_v17 }
 0x278 PF: > { %s14_s15 = sadd.s32 1, %s1098_s15  }
 0x279   : > { %p11_p4 = scmp.ge.s32.totalorder %s14_s15, 4  }
 0x27b   :  { %13 = sbr.rel (!%p11_p4) target bundleno = 1 (0x1), region = 66 }

</bundles_post_ra>
